<compile_context>
chip_gen: v7x
topology: tpu7x:2x2x1
jax: 0.10.0
libtpu: 0.0.40
codegen_flags: <defaults>
</compile_context>

<pallas_src>
import functools
import math

import jax
import jax.numpy as jnp
from jax import lax
from jax.experimental import pallas as pl
from jax.experimental.pallas import tpu as pltpu


def _compute_vmem_limit():
    """3/4 of physical VMEM, capped at 96 MiB (v5e/v6e ~96 MiB, v7x ~48 MiB)."""
    try:
        cap = int(pltpu.get_tpu_info().vmem_capacity_bytes)
    except Exception:
        cap = 64 * 1024 * 1024
    return max(32 * 1024 * 1024, min(3 * cap // 4, 96 * 1024 * 1024))


_VMEM_LIMIT = _compute_vmem_limit()


def _round_up(x, m):
    return ((x + m - 1) // m) * m


def _pick_tile(dim, candidates, sublane_fallback=False):
    """Largest MXU/lane-friendly tile that divides `dim`.

    For sublane (row) dims fall back to the largest multiple-of-8 divisor instead of one giant
    misaligned tile; for lane dims fall back to the full dim (full-extent blocks are allowed).
    """
    for c in candidates:
        if dim >= c and dim % c == 0:
            return c
    if sublane_fallback and dim > 8:
        for c in range((min(dim, 512) // 8) * 8, 0, -8):
            if c > 0 and dim % c == 0:
                return c
    return dim


_M_TILES = (512, 256, 128, 64, 32, 16, 8)
_N_TILES = (1024, 512, 256, 128)
_K_TILES = (512, 256, 128)


# ----------------------------- Pallas kernels ------------------------------ #

def _linear_kernel(x_ref, w_ref, b_ref, o_ref, acc_ref, *, activation):
    """Tiled y = x @ w + b (+ optional ReLU). Grid (M/tm, N/tn, K/tk), K accumulated."""
    @pl.when(pl.program_id(2) == 0)
    def _():
        acc_ref[...] = jnp.zeros_like(acc_ref)

    acc_ref[...] += jnp.dot(x_ref[...], w_ref[...], preferred_element_type=jnp.float32)

    @pl.when(pl.program_id(2) == pl.num_programs(2) - 1)
    def _():
        y = acc_ref[...] + b_ref[...]
        if activation == "relu":
            y = jnp.maximum(y, 0.0)
        o_ref[...] = y.astype(o_ref.dtype)


def linear(x, w_t, b, activation=None, out_dtype=jnp.bfloat16):
    """y = x @ w_t + b with w_t pre-transposed (K, N) bf16; x bf16; out bf16 (f32 for logits)."""
    x = x.astype(jnp.bfloat16)
    M, K = x.shape
    _, N = w_t.shape
    tm = _pick_tile(M, _M_TILES, sublane_fallback=True)
    tn = _pick_tile(N, _N_TILES)
    tk = _pick_tile(K, _K_TILES)
    grid = (M // tm, N // tn, K // tk)
    kernel = functools.partial(_linear_kernel, activation=activation)
    return pl.pallas_call(
        kernel,
        out_shape=jax.ShapeDtypeStruct((M, N), out_dtype),
        grid=grid,
        in_specs=[
            pl.BlockSpec((tm, tk), lambda i, j, k: (i, k)),
            pl.BlockSpec((tk, tn), lambda i, j, k: (k, j)),
            pl.BlockSpec((1, tn), lambda i, j, k: (0, j)),
        ],
        out_specs=pl.BlockSpec((tm, tn), lambda i, j, k: (i, j)),
        scratch_shapes=[pltpu.VMEM((tm, tn), jnp.float32)],
        compiler_params=pltpu.CompilerParams(
            dimension_semantics=("parallel", "parallel", "arbitrary"),
            vmem_limit_bytes=_VMEM_LIMIT),
    )(x, w_t, b)


def _stacked_linear_kernel(x_ref, w_ref, b_ref, o_ref, acc_ref):
    """Tiled out[p] = x @ w[p] + b[p].  Grid (P, M/tm, K/tk), K accumulated."""
    @pl.when(pl.program_id(2) == 0)
    def _():
        acc_ref[...] = jnp.zeros_like(acc_ref)

    acc_ref[...] += jnp.dot(x_ref[...], w_ref[0], preferred_element_type=jnp.float32)

    @pl.when(pl.program_id(2) == pl.num_programs(2) - 1)
    def _():
        o_ref[0] = (acc_ref[...] + b_ref[0]).astype(o_ref.dtype)


def stacked_linear(x, w_stack, b_stack):
    """x: (M, K) bf16, w_stack: (P, K, N) bf16, b_stack: (P, 1, N) f32 -> (P, M, N) bf16.

    Used for fused QKV (P=3) / KV (P=2) projections so the attention kernel can index the
    stacked output along the leading axis — no JAX-side lane-axis slicing of (M, 3D).
    """
    x = x.astype(jnp.bfloat16)
    M, K = x.shape
    P, _, N = w_stack.shape
    tm = _pick_tile(M, _M_TILES, sublane_fallback=True)
    tk = _pick_tile(K, _K_TILES)
    grid = (P, M // tm, K // tk)
    return pl.pallas_call(
        _stacked_linear_kernel,
        out_shape=jax.ShapeDtypeStruct((P, M, N), jnp.bfloat16),
        grid=grid,
        in_specs=[
            pl.BlockSpec((tm, tk), lambda p, i, k: (i, k)),
            pl.BlockSpec((1, tk, N), lambda p, i, k: (p, k, 0)),
            pl.BlockSpec((1, 1, N), lambda p, i, k: (p, 0, 0)),
        ],
        out_specs=pl.BlockSpec((1, tm, N), lambda p, i, k: (p, i, 0)),
        scratch_shapes=[pltpu.VMEM((tm, N), jnp.float32)],
        compiler_params=pltpu.CompilerParams(
            dimension_semantics=("parallel", "parallel", "arbitrary"),
            vmem_limit_bytes=_VMEM_LIMIT),
    )(x, w_stack, b_stack)


def _linear_add_ln_kernel(x_ref, w_ref, b_ref, r_ref, g_ref, be_ref, o_ref, acc_ref, *, eps):
    """Tiled out = LayerNorm(resid + (x @ w + b)).  Grid (M/tm, K/tk); full D on lanes."""
    @pl.when(pl.program_id(1) == 0)
    def _():
        acc_ref[...] = jnp.zeros_like(acc_ref)

    acc_ref[...] += jnp.dot(x_ref[...], w_ref[...], preferred_element_type=jnp.float32)

    @pl.when(pl.program_id(1) == pl.num_programs(1) - 1)
    def _():
        h = acc_ref[...] + b_ref[...] + r_ref[...].astype(jnp.float32)
        mean = jnp.mean(h, axis=-1, keepdims=True)
        c = h - mean
        var = jnp.mean(c * c, axis=-1, keepdims=True)
        o_ref[...] = (c * lax.rsqrt(var + eps) * g_ref[...] + be_ref[...]).astype(o_ref.dtype)


def linear_add_ln(x, w_t, b, resid, gamma, beta, eps=1e-5):
    """Fused matmul + residual add + post-LayerNorm epilogue (attention out-projection)."""
    x = x.astype(jnp.bfloat16)
    M, K = x.shape
    _, N = w_t.shape  # N == d_model (kept whole on lanes so LN reduces in-tile)
    tm = _pick_tile(M, _M_TILES, sublane_fallback=True)
    tk = _pick_tile(K, _K_TILES)
    grid = (M // tm, K // tk)
    kernel = functools.partial(_linear_add_ln_kernel, eps=eps)
    return pl.pallas_call(
        kernel,
        out_shape=jax.ShapeDtypeStruct((M, N), jnp.bfloat16),
        grid=grid,
        in_specs=[
            pl.BlockSpec((tm, tk), lambda i, k: (i, k)),
            pl.BlockSpec((tk, N), lambda i, k: (k, 0)),
            pl.BlockSpec((1, N), lambda i, k: (0, 0)),
            pl.BlockSpec((tm, N), lambda i, k: (i, 0)),
            pl.BlockSpec((1, N), lambda i, k: (0, 0)),
            pl.BlockSpec((1, N), lambda i, k: (0, 0)),
        ],
        out_specs=pl.BlockSpec((tm, N), lambda i, k: (i, 0)),
        scratch_shapes=[pltpu.VMEM((tm, N), jnp.float32)],
        compiler_params=pltpu.CompilerParams(
            dimension_semantics=("parallel", "arbitrary"),
            vmem_limit_bytes=_VMEM_LIMIT),
    )(x, w_t, b, resid, gamma, beta)


def _ffn_add_ln_kernel(x_ref, w1_ref, b1_ref, w2_ref, b2_ref, r_ref, g_ref, be_ref,
                       o_ref, acc_ref, *, eps):
    """Fused FFN: out = LayerNorm(resid + relu(x@w1+b1)@w2 + b2).

    Grid (M/tm, dff/tf); the (tm, tf) hidden chunk never leaves the kernel and the (tm, D)
    accumulator lives in VMEM scratch — no (M, dff) HBM round trip.
    """
    @pl.when(pl.program_id(1) == 0)
    def _():
        acc_ref[...] = jnp.zeros_like(acc_ref)

    h = jnp.dot(x_ref[...], w1_ref[...], preferred_element_type=jnp.float32) + b1_ref[...]
    h = jnp.maximum(h, 0.0).astype(jnp.bfloat16)
    acc_ref[...] += jnp.dot(h, w2_ref[...], preferred_element_type=jnp.float32)

    @pl.when(pl.program_id(1) == pl.num_programs(1) - 1)
    def _():
        y = acc_ref[...] + b2_ref[...] + r_ref[...].astype(jnp.float32)
        mean = jnp.mean(y, axis=-1, keepdims=True)
        c = y - mean
        var = jnp.mean(c * c, axis=-1, keepdims=True)
        o_ref[...] = (c * lax.rsqrt(var + eps) * g_ref[...] + be_ref[...]).astype(o_ref.dtype)


def ffn_add_ln(x, w1_t, b1, w2_t, b2, resid, gamma, beta, eps=1e-5):
    x = x.astype(jnp.bfloat16)
    M, D = x.shape
    _, F = w1_t.shape
    tm = _pick_tile(M, _M_TILES, sublane_fallback=True)
    tf = _pick_tile(F, _K_TILES)
    grid = (M // tm, F // tf)
    kernel = functools.partial(_ffn_add_ln_kernel, eps=eps)
    return pl.pallas_call(
        kernel,
        out_shape=jax.ShapeDtypeStruct((M, D), jnp.bfloat16),
        grid=grid,
        in_specs=[
            pl.BlockSpec((tm, D), lambda i, f: (i, 0)),
            pl.BlockSpec((D, tf), lambda i, f: (0, f)),
            pl.BlockSpec((1, tf), lambda i, f: (0, f)),
            pl.BlockSpec((tf, D), lambda i, f: (f, 0)),
            pl.BlockSpec((1, D), lambda i, f: (0, 0)),
            pl.BlockSpec((tm, D), lambda i, f: (i, 0)),
            pl.BlockSpec((1, D), lambda i, f: (0, 0)),
            pl.BlockSpec((1, D), lambda i, f: (0, 0)),
        ],
        out_specs=pl.BlockSpec((tm, D), lambda i, f: (i, 0)),
        scratch_shapes=[pltpu.VMEM((tm, D), jnp.float32)],
        compiler_params=pltpu.CompilerParams(
            dimension_semantics=("parallel", "arbitrary"),
            vmem_limit_bytes=_VMEM_LIMIT),
    )(x, w1_t, b1, w2_t, b2, resid, gamma, beta)


def _attention_kernel(q_ref, k_ref, v_ref, o_ref, *, nhead, scale, causal):
    """Per-batch multi-head attention in bf16; scale folded into q; per-head direct stores.

    Causal mask (if any) is generated in-kernel via iota -> no (Lq, Lk) mask DMA.
    """
    Lq, D = q_ref.shape[2], q_ref.shape[3]
    Lk = k_ref.shape[2]
    dh = D // nhead

    q = q_ref[0, 0]   # (Lq, D) bf16
    k = k_ref[0, 0]   # (Lk, D) bf16
    v = v_ref[0, 0]   # (Lk, D) bf16

    if causal:
        row = lax.broadcasted_iota(jnp.int32, (Lq, Lk), 0)
        col = lax.broadcasted_iota(jnp.int32, (Lq, Lk), 1)
        allow = col <= row

    # TODO(synk): for long sequences replace the full-score path with flash-style KV tiling
    # (grid over KV blocks with m/l/acc scratch) and a head-batched dot_general; at these
    # lengths the per-head loop with direct stores is MXU-bound-free and fits VMEM easily.
    for h in range(nhead):
        qh = q[:, h * dh:(h + 1) * dh] * scale           # scale folded into q (O(Lq*dh))
        kh = k[:, h * dh:(h + 1) * dh]
        vh = v[:, h * dh:(h + 1) * dh]
        s = lax.dot_general(qh, kh, (((1,), (1,)), ((), ())),
                            preferred_element_type=jnp.float32)
        if causal:
            s = jnp.where(allow, s, -1e30)
        s = s - jnp.max(s, axis=-1, keepdims=True)
        p = jnp.exp(s)
        p = p * pl.reciprocal(jnp.sum(p, axis=-1, keepdims=True), approx=True)
        oh = jnp.dot(p.astype(jnp.bfloat16), vh, preferred_element_type=jnp.float32)
        o_ref[0, :, h * dh:(h + 1) * dh] = oh.astype(o_ref.dtype)   # direct store, no concat


def attention(q_arr, k_arr, v_arr, q_idx, k_idx, v_idx, nhead, causal):
    """q_arr/k_arr/v_arr: stacked (P, B, L, D) bf16 arrays (may alias); indices pick the part.

    The leading-axis BlockSpec indexing replaces JAX-side slicing of a fused (M, 3D) matmul
    output, so no lane-axis relayout copies or extra HBM round trips are generated.
    """
    B, Lq, D = q_arr.shape[1], q_arr.shape[2], q_arr.shape[3]
    Lk = k_arr.shape[2]
    kernel = functools.partial(_attention_kernel, nhead=nhead,
                               scale=1.0 / math.sqrt(D // nhead), causal=causal)
    return pl.pallas_call(
        kernel,
        out_shape=jax.ShapeDtypeStruct((B, Lq, D), jnp.bfloat16),
        grid=(B,),
        in_specs=[
            pl.BlockSpec((1, 1, Lq, D), lambda b: (q_idx, b, 0, 0)),
            pl.BlockSpec((1, 1, Lk, D), lambda b: (k_idx, b, 0, 0)),
            pl.BlockSpec((1, 1, Lk, D), lambda b: (v_idx, b, 0, 0)),
        ],
        out_specs=pl.BlockSpec((1, Lq, D), lambda b: (b, 0, 0)),
        compiler_params=pltpu.CompilerParams(
            dimension_semantics=("parallel",),
            vmem_limit_bytes=_VMEM_LIMIT),
    )(q_arr, k_arr, v_arr)


# ------------------------- transformer building blocks --------------------- #

def encoder_layer(x, p, nhead):
    B, L, D = x.shape
    x2 = x.reshape(B * L, D)
    sa = p["self_attn"]
    qkv = stacked_linear(x2, sa["qkv_w_t"], sa["qkv_b"]).reshape(3, B, L, D)
    a = attention(qkv, qkv, qkv, 0, 1, 2, nhead, causal=False).reshape(B * L, D)
    # out-projection fused with residual + LayerNorm
    x2 = linear_add_ln(a, sa["out_w_t"], sa["out_b"], x2, p["ln1_g"], p["ln1_b"])
    # fused FFN (lin1 + ReLU + lin2 + residual + LayerNorm), (M, dff) never hits HBM
    x2 = ffn_add_ln(x2, p["lin1_w_t"], p["lin1_b"], p["lin2_w_t"], p["lin2_b"],
                    x2, p["ln2_g"], p["ln2_b"])
    return x2.reshape(B, L, D)


def decoder_layer(x, memory, p, nhead):
    B, L, D = x.shape
    Lk = memory.shape[1]
    x2 = x.reshape(B * L, D)

    sa = p["self_attn"]
    qkv = stacked_linear(x2, sa["qkv_w_t"], sa["qkv_b"]).reshape(3, B, L, D)
    a = attention(qkv, qkv, qkv, 0, 1, 2, nhead, causal=True).reshape(B * L, D)
    x2 = linear_add_ln(a, sa["out_w_t"], sa["out_b"], x2, p["ln1_g"], p["ln1_b"])

    ca = p["cross_attn"]
    q = linear(x2, ca["q_w_t"], ca["q_b"]).reshape(1, B, L, D)
    kv = stacked_linear(memory.reshape(B * Lk, D), ca["kv_w_t"], ca["kv_b"]).reshape(2, B, Lk, D)
    c = attention(q, kv, kv, 0, 0, 1, nhead, causal=False).reshape(B * L, D)
    x2 = linear_add_ln(c, ca["out_w_t"], ca["out_b"], x2, p["ln2_g"], p["ln2_b"])

    x2 = ffn_add_ln(x2, p["lin1_w_t"], p["lin1_b"], p["lin2_w_t"], p["lin2_b"],
                    x2, p["ln3_g"], p["ln3_b"])
    return x2.reshape(B, L, D)


def positional_encoding(max_len, d_model):
    pos = jnp.arange(max_len, dtype=jnp.float32)[:, None]
    div = jnp.exp(jnp.arange(0, d_model, 2, dtype=jnp.float32) * (-math.log(10000.0) / d_model))
    ang = pos * div                                      # (max_len, ceil(d/2))
    pe = jnp.zeros((max_len, d_model), jnp.float32)
    pe = pe.at[:, 0::2].set(jnp.sin(ang))
    pe = pe.at[:, 1::2].set(jnp.cos(ang)[:, : d_model // 2])   # guard odd d_model
    return pe  # (max_len, d_model)


def code_generator_transformer_forward(params, src, tgt, cfg):
    D, nhead, vocab = cfg["d_model"], cfg["nhead"], cfg["vocab_size"]
    B, Ls = src.shape
    _, Lt = tgt.shape
    pe = positional_encoding(max(Ls, Lt), D)

    # TODO(synk): embedding gather stays in plain JAX (data-dependent HBM gather).
    src_emb = (params["embedding"][src] * math.sqrt(D) + pe[:Ls][None]).astype(jnp.bfloat16)
    tgt_emb = (params["embedding"][tgt] * math.sqrt(D) + pe[:Lt][None]).astype(jnp.bfloat16)

    memory = src_emb
    for lp in params["encoder_layers"]:
        memory = encoder_layer(memory, lp, nhead)

    out = tgt_emb
    for lp in params["decoder_layers"]:
        out = decoder_layer(out, memory, lp, nhead)

    # final projection against the lane-padded vocab (f32 logits), then slice off padding
    logits = linear(out.reshape(B * Lt, D), params["fc_out_w_t"], params["fc_out_b"],
                    out_dtype=jnp.float32)
    return logits[:, :vocab].reshape(B, Lt, vocab)


# ------------------------------- parameters -------------------------------- #
# Weights are stored pre-transposed to (K, N) in bf16 (PyTorch convention is (N, K) f32);
# QKV / KV weights are stacked on a leading axis; biases / LayerNorm params stay f32.
# fc_out is padded on N to a multiple of 128 lanes.

def _init_dense(key, k_in, n_out):
    w = jax.random.normal(key, (n_out, k_in), jnp.float32) * 0.02   # PyTorch (N, K)
    return {"w_t": jnp.asarray(w.T, jnp.bfloat16),
            "b": jnp.zeros((1, n_out), jnp.float32)}


def _init_mha(key, d):
    k1, k2 = jax.random.split(key)
    in_w = jax.random.normal(k1, (3 * d, d), jnp.float32) * 0.02    # PyTorch in_proj_weight
    in_b = jnp.zeros((3 * d,), jnp.float32)
    out = _init_dense(k2, d, d)
    w_stack = jnp.stack([jnp.asarray(in_w[p * d:(p + 1) * d].T, jnp.bfloat16)
                         for p in range(3)], axis=0)                # (3, d, d)
    b_stack = in_b.reshape(3, 1, d)
    return {
        "qkv_w_t": w_stack,                                         # (3, d, d) bf16
        "qkv_b": b_stack,                                           # (3, 1, d) f32
        "q_w_t": w_stack[0], "q_b": b_stack[0],                     # (d, d), (1, d)
        "kv_w_t": w_stack[1:], "kv_b": b_stack[1:],                 # (2, d, d), (2, 1, d)
        "out_w_t": out["w_t"], "out_b": out["b"],
    }


def _init_encoder_layer(key, d_model, dff):
    ks = jax.random.split(key, 3)
    lin1 = _init_dense(ks[1], d_model, dff)
    lin2 = _init_dense(ks[2], dff, d_model)
    return {
        "self_attn": _init_mha(ks[0], d_model),
        "lin1_w_t": lin1["w_t"], "lin1_b": lin1["b"],
        "lin2_w_t": lin2["w_t"], "lin2_b": lin2["b"],
        "ln1_g": jnp.ones((1, d_model), jnp.float32), "ln1_b": jnp.zeros((1, d_model), jnp.float32),
        "ln2_g": jnp.ones((1, d_model), jnp.float32), "ln2_b": jnp.zeros((1, d_model), jnp.float32),
    }


def _init_decoder_layer(key, d_model, dff):
    ks = jax.random.split(key, 4)
    lin1 = _init_dense(ks[2], d_model, dff)
    lin2 = _init_dense(ks[3], dff, d_model)
    return {
        "self_attn": _init_mha(ks[0], d_model),
        "cross_attn": _init_mha(ks[1], d_model),
        "lin1_w_t": lin1["w_t"], "lin1_b": lin1["b"],
        "lin2_w_t": lin2["w_t"], "lin2_b": lin2["b"],
        "ln1_g": jnp.ones((1, d_model), jnp.float32), "ln1_b": jnp.zeros((1, d_model), jnp.float32),
        "ln2_g": jnp.ones((1, d_model), jnp.float32), "ln2_b": jnp.zeros((1, d_model), jnp.float32),
        "ln3_g": jnp.ones((1, d_model), jnp.float32), "ln3_b": jnp.zeros((1, d_model), jnp.float32),
    }


def init_params(key, vocab_size, d_model, dff, num_enc, num_dec):
    keys = jax.random.split(key, 2 + num_enc + num_dec)
    # fc_out padded on the vocab (N) axis to a multiple of 128 lanes for unmasked stores
    vocab_pad = _round_up(vocab_size, 128)
    fc_w = jax.random.normal(keys[1], (vocab_size, d_model), jnp.float32) * 0.02
    fc_w_pad = jnp.zeros((vocab_pad, d_model), jnp.float32).at[:vocab_size].set(fc_w)
    return {
        "embedding": jax.random.normal(keys[0], (vocab_size, d_model), jnp.float32) * 0.02,
        "encoder_layers": [_init_encoder_layer(keys[2 + i], d_model, dff) for i in range(num_enc)],
        "decoder_layers": [_init_decoder_layer(keys[2 + num_enc + i], d_model, dff)
                           for i in range(num_dec)],
        "fc_out_w_t": jnp.asarray(fc_w_pad.T, jnp.bfloat16),        # (d_model, vocab_pad)
        "fc_out_b": jnp.zeros((1, vocab_pad), jnp.float32),
    }


# ---------------------------------- main ------------------------------------ #

if __name__ == "__main__":
    # small, module-consistent shapes; d_model=128 keeps every output store lane-dense
    cfg = {"vocab_size": 50, "d_model": 128, "nhead": 4,
           "num_encoder_layers": 2, "num_decoder_layers": 2, "dim_feedforward": 256}
    B, Ls, Lt = 2, 8, 8

    key = jax.random.PRNGKey(0)
    kp, ks, kt = jax.random.split(key, 3)
    params = init_params(kp, cfg["vocab_size"], cfg["d_model"], cfg["dim_feedforward"],
                         cfg["num_encoder_layers"], cfg["num_decoder_layers"])
    src = jax.random.randint(ks, (B, Ls), 0, cfg["vocab_size"], dtype=jnp.int32)
    tgt = jax.random.randint(kt, (B, Lt), 0, cfg["vocab_size"], dtype=jnp.int32)

    # NOTE: dropout layers act as identity (inference semantics).
    logits = code_generator_transformer_forward(params, src, tgt, cfg)
    logits = jax.block_until_ready(logits)

    assert logits.shape == (B, Lt, cfg["vocab_size"])
    assert bool(jnp.all(jnp.isfinite(logits)))
    print("KERNEL_OK")
</pallas_src>

<mosaic_0001>
module attributes {stable_mosaic.version = 11 : i64} {
  func.func @_stacked_linear_kernel(%arg0: i32, %arg1: i32, %arg2: i32, %arg3: memref<16x128xbf16, #tpu.memory_space<vmem>>, %arg4: memref<1x128x128xbf16, #tpu.memory_space<vmem>>, %arg5: memref<1x1x128xf32, #tpu.memory_space<vmem>>, %arg6: memref<1x16x128xbf16, #tpu.memory_space<vmem>>, %arg7: memref<16x128xf32, #tpu.memory_space<vmem>>) attributes {dimension_semantics = [#tpu.dimension_semantics<parallel>, #tpu.dimension_semantics<parallel>, #tpu.dimension_semantics<arbitrary>], iteration_bounds = array<i64: 3, 1, 1>, scalar_prefetch = 0 : i64, scratch_operands = 1 : i64, tpu.core_type = #tpu.core_type<tc>, window_params = [{transform_indices = @transform_0, window_bounds = array<i64: 16, 128>}, {transform_indices = @transform_1, window_bounds = array<i64: 1, 128, 128>}, {transform_indices = @transform_2, window_bounds = array<i64: 1, 1, 128>}, {transform_indices = @transform_3, window_bounds = array<i64: 1, 16, 128>}]} {
    %c0_i32 = arith.constant 0 : i32
    %0 = arith.cmpi eq, %arg2, %c0_i32 : i32
    %1 = arith.extui %0 : i1 to i32
    %c0_i32_0 = arith.constant 0 : i32
    %2 = arith.cmpi ne, %1, %c0_i32_0 : i32
    scf.if %2 {
      %cst_11 = arith.constant 0.000000e+00 : f32
      %13 = vector.broadcast %cst_11 : f32 to vector<16x128xf32>
      %c0_12 = arith.constant 0 : index
      %c0_13 = arith.constant 0 : index
      %14 = vector.load %arg7[%c0_12, %c0_13] : memref<16x128xf32, #tpu.memory_space<vmem>>, vector<16x128xf32>
      tpu.vector_store %arg7[%c0_12, %c0_13], %13 {strides = array<i32>} : memref<16x128xf32, #tpu.memory_space<vmem>>, vector<16x128xf32>,
    } else {
    }
    %c0 = arith.constant 0 : index
    %c0_1 = arith.constant 0 : index
    %3 = vector.load %arg7[%c0, %c0_1] : memref<16x128xf32, #tpu.memory_space<vmem>>, vector<16x128xf32>
    %c0_2 = arith.constant 0 : index
    %c0_3 = arith.constant 0 : index
    %4 = vector.load %arg3[%c0_2, %c0_3] : memref<16x128xbf16, #tpu.memory_space<vmem>>, vector<16x128xbf16>
    %c0_4 = arith.constant 0 : index
    %c0_5 = arith.constant 0 : index
    %c0_6 = arith.constant 0 : index
    %5 = vector.load %arg4[%c0_4, %c0_5, %c0_6] : memref<1x128x128xbf16, #tpu.memory_space<vmem>>, vector<1x128x128xbf16>
    %6 = vector.shape_cast %5 : vector<1x128x128xbf16> to vector<128x128xbf16>
    %cst = arith.constant dense<0.000000e+00> : vector<16x128xf32>
    %7 = tpu.matmul %4, %6, %cst {dimension_numbers = #tpu.dot_dimension_numbers<[1], [0], [0], [1], [0, 0, 1, 1], [], []>} : vector<16x128xbf16>, vector<128x128xbf16>, vector<16x128xf32> -> vector<16x128xf32>
    %8 = arith.addf %3, %7 : vector<16x128xf32>
    %c0_7 = arith.constant 0 : index
    %c0_8 = arith.constant 0 : index
    %9 = vector.load %arg7[%c0_7, %c0_8] : memref<16x128xf32, #tpu.memory_space<vmem>>, vector<16x128xf32>
    tpu.vector_store %arg7[%c0_7, %c0_8], %8 {strides = array<i32>} : memref<16x128xf32, #tpu.memory_space<vmem>>, vector<16x128xf32>,
    %c0_i32_9 = arith.constant 0 : i32
    %10 = arith.cmpi eq, %arg2, %c0_i32_9 : i32
    %11 = arith.extui %10 : i1 to i32
    %c0_i32_10 = arith.constant 0 : i32
    %12 = arith.cmpi ne, %11, %c0_i32_10 : i32
    scf.if %12 {
      %c0_11 = arith.constant 0 : index
      %c0_12 = arith.constant 0 : index
      %13 = vector.load %arg7[%c0_11, %c0_12] : memref<16x128xf32, #tpu.memory_space<vmem>>, vector<16x128xf32>
      %c0_13 = arith.constant 0 : index
      %c0_14 = arith.constant 0 : index
      %c0_15 = arith.constant 0 : index
      %14 = vector.load %arg5[%c0_13, %c0_14, %c0_15] : memref<1x1x128xf32, #tpu.memory_space<vmem>>, vector<1x1x128xf32>
      %15 = vector.shape_cast %14 : vector<1x1x128xf32> to vector<1x128xf32>
      %16 = vector.broadcast %15 : vector<1x128xf32> to vector<16x128xf32>
      %17 = arith.addf %13, %16 : vector<16x128xf32>
      %18 = arith.truncf %17 : vector<16x128xf32> to vector<16x128xbf16>
      %c0_16 = arith.constant 0 : index
      %c0_17 = arith.constant 0 : index
      %c0_18 = arith.constant 0 : index
      %19 = vector.load %arg6[%c0_16, %c0_17, %c0_18] : memref<1x16x128xbf16, #tpu.memory_space<vmem>>, vector<1x16x128xbf16>
      %20 = vector.shape_cast %19 : vector<1x16x128xbf16> to vector<16x128xbf16>
      %21 = vector.shape_cast %18 : vector<16x128xbf16> to vector<1x16x128xbf16>
      tpu.vector_store %arg6[%c0_16, %c0_17, %c0_18], %21 {strides = array<i32>} : memref<1x16x128xbf16, #tpu.memory_space<vmem>>, vector<1x16x128xbf16>,
    } else {
    }
    return
  }
  func.func @transform_0(%arg0: i32, %arg1: i32, %arg2: i32) -> (i32, i32) {
    %c0_i32 = arith.constant 0 : i32
    return %arg1, %arg2 : i32, i32
  }
  func.func @transform_1(%arg0: i32, %arg1: i32, %arg2: i32) -> (i32, i32, i32) {
    %c0_i32 = arith.constant 0 : i32
    %c0_i32_0 = arith.constant 0 : i32
    return %arg0, %arg2, %c0_i32 : i32, i32, i32
  }
  func.func @transform_2(%arg0: i32, %arg1: i32, %arg2: i32) -> (i32, i32, i32) {
    %c0_i32 = arith.constant 0 : i32
    %c0_i32_0 = arith.constant 0 : i32
    %c0_i32_1 = arith.constant 0 : i32
    return %arg0, %c0_i32, %c0_i32_0 : i32, i32, i32
  }
  func.func @transform_3(%arg0: i32, %arg1: i32, %arg2: i32) -> (i32, i32, i32) {
    %c0_i32 = arith.constant 0 : i32
    %c0_i32_0 = arith.constant 0 : i32
    return %arg0, %arg1, %c0_i32 : i32, i32, i32
  }
}

</mosaic_0001>

<bundles_post_ra>
// kernel: tpu_custom_call.1
= control target key start
LH: loop header
LB: loop body
LE: loop exit
PB: predicated region body
PF: predicated region fallthrough
CT: control target
= control target key end

     0   :  { %8 = vsyncpa [#allocation4], 0  ;;  %s1097_s0 = inlined_call_operand.hbm [shape: bf16[16,128], index: 0, kind: input, shape index: {}]   ;;  %s1098_s1 = inlined_call_operand.hbm [shape: bf16[3,128,128], index: 1, kind: input, shape index: {}]   ;;  %s1099_s2 = inlined_call_operand.vmem [shape: f32[3,1,128], index: 2, kind: input, shape index: {}]   ;;  %s1100_s3 = inlined_call_operand.hbm [shape: bf16[3,16,128], index: 3, kind: output, shape index: {}]  }
   0x1   :  { %9 = vsyncpa [#allocation7], 0 }
   0x2   :  { %11 = vsyncpa [#allocation7 + $0x1], 0 }
   0x3   :  { %12 = vsyncpa [#allocation5], 0 }
   0x4   :  { %14 = vsyncpa [#allocation5 + $0x1], 0  ;;  %s868_s12 = smov 0   ;;  %s870_s13 = smov 0  }
   0x5   :  { %s872_s14 = smov 0   ;;  %s874_s15 = smov 0  }
   0x6   :  { %s876_s16 = smov 0   ;;  %s878_s17 = smov 0  }
   0x7 LB: > { %s538_s18 = sadd.s32 4294967295, %s837_s17   ;;  %s539_s19 = sadd.s32 4294967294, %s837_s17   ;;  %s837_s17 = sphi %s878_s17, %s20_s17   ;;  %s833_s16 = sphi %s876_s16, %s1123_s16   ;;  %s829_s15 = sphi %s874_s15, %s1122_s15   ;;  %s825_s14 = sphi %s872_s14, %s1121_s14   ;;  %s821_s13 = sphi %s870_s13, %s1120_s13   ;;  %s817_s12 = sphi %s868_s12, %s1119_s12  }
   0x8   : > { %p89_p0 = scmp.ne.s32.totalorder %s821_s13, %s817_s12  ;;  %p902_p1 = scmp.eq.s32.totalorder %s538_s18, 0 }
   0x9   : > { %p906_p2 = scmp.eq.s32.totalorder %s538_s18, 2  ;;  %p147_p3 = scmp.eq.s32.totalorder %s539_s19, 2 }
   0xa   : > { %s1105_s20 = scalar_select %p902_p1, 1, 0 }
   0xb   : > { %s1106_s21 = scalar_select %p906_p2, 1, 0 }
   0xc   : > { %p912_p4 = por %p902_p1, %p89_p0  ;;  %p540_p5 = scmp.ge.s32.totalorder %s837_s17, 1 }
   0xd   : > { %p917_p6 = por %p147_p3, %p89_p0  ;;  %p154_p7 = scmp.lt.s32.totalorder %s837_s17, 4 }
   0xe   : > { %s1107_s22 = scalar_select %p912_p4, 1, 0 }
   0xf   : > { %s1108_s23 = scalar_select %p917_p6, 1, 0 }
  0x10   : > { %p922_p8 = pnand %p540_p5, %p154_p7  ;;  %s839_s25 = smov [#allocation3]  }
  0x11   : > { %s170_s26 = sshll.u32 %s839_s25, 4  ;;  %s39_s28 = sadd.s32 1, %s833_s16  ;;  %s171_s26 = int_to_ptr.vmem [resolvable:$true] %s170_s26 }
  0x12   : > { %s1109_s24 = scalar_select %p922_p8, 1, 0 }
  0x13   : > { %p613_p9 = pneg %p922_p8  ;;  %s693_s4 = scalar_lea.hbm %s1097_s0, 128 }
  0x14   : > { %p694_p11 = scmp.ne.s32.totalorder %s1097_s0, %s693_s4  ;;  %p700_p3 = scmp.lt.u32.totalorder %s693_s4, %s1097_s0 }
  0x15   : > { %p930_p10 = pnand %p613_p9, %p902_p1 }
  0x17   : > { %p695_p12 = pneg %p930_p10 }
  0x19   : > { %p696_p13 = pnand %p695_p12, %p694_p11 }
  0x1b   : > { %p697_p0 = pneg %p696_p13 }
  0x1d   : > { %p702_p5 = pnand %p700_p3, %p697_p0 }
  0x1f   : > { %705 = shalt.err (!%p702_p5)
}
  0x20   : > { %s706_s9 = scalar_lea.vmem %s171_s26, 128  ;;  %p714_p4 = scmp.lt.s32.totalorder %s171_s26, %s171_s26 }
  0x21   : > { %p707_p7 = scmp.ne.s32.totalorder %s171_s26, %s706_s9  ;;  %p715_p1 = scmp.lt.s32.totalorder %s706_s9, %s706_s9 }
  0x23   : > { %p709_p9 = pnand %p707_p7, %p695_p12  ;;  %p716_p8 = por %p715_p1, %p714_p4 }
  0x25   : > { %p710_p6 = pneg %p709_p9 }
  0x27   : > { %p717_p2 = pnand %p716_p8, %p710_p6 }
  0x29   : > { %720 = shalt.err (!%p717_p2)
}
  0x2a   : > { %s840_s10 = smov 64   ;;  %s841_s11 = smov 4  }
  0x2b   : > { %616 = dma.hbm_to_vmem [thread:$0]  (!%p930_p10), %s1097_s0, 128, %s171_s26, [#allocation4], %s840_s10, %s840_s10, %s841_s11  }
  0x2c   : > { %p41_p1 = scmp.ge.s32.totalorder %s39_s28, 3  ;;  %s76_s25 = sadd.s32 1, %s825_s14 }
  0x2d   : > { %p83_p2 = scmp.ne.s32.totalorder %s825_s14, %s821_s13  ;;  %p84_p4 = scmp.eq.s32.totalorder %s837_s17, 0 }
  0x2e   : > { %s1125_s28 = smov (%p41_p1, %s39_s28), 0  ;;  %p1112_p8 = scmp.ne.s32.totalorder %s1106_s21, 0 }
  0x2f   : > { %p960_p6 = por %p84_p4, %p83_p2  ;;  %s71_s30 = ssub.s32 %s833_s16, %s1125_s28 }
  0x30   : > { %p966_p11 = por %p1112_p8, %p83_p2  ;;  %p626_p12 = scmp.lt.s32.totalorder %s837_s17, 3 }
  0x31   : > { %p74_p10 = scmp.eq.s32.totalorder %s71_s30, 0  ;;  %s184_s26 = sand.u32 1, %s825_s14  }
  0x32   : > { %s543_s4 = sshll.u32 %s184_s26, 6  ;;  %s567_s6 = sshll.u32 %s833_s16, 10 }
  0x33   : > { %s975_s5 = scalar_select %p74_p10, %s825_s14, %s76_s25  }
  0x34   : > { %s981_s9 = scalar_lea.hbm %s1098_s1, %s567_s6  ;;  %s188_s21 = scalar_lea.vmem [#allocation6], %s543_s4 }
  0x35   : > { %s197_s18 = sshll.u32 %s188_s21, 4  ;;  %p987_p13 = pnand %p626_p12, %p960_p6  ;;  %s983_s18 = int_to_ptr.vmem [resolvable:$true] %s197_s18 }
  0x36   : > { %s991_s25 = scalar_lea.sflag [#allocation7], %s184_s26  ;;  %s721_s30 = scalar_lea.hbm %s981_s9, 1024 }
  0x37   : > { %p722_p0 = scmp.ne.s32.totalorder %s981_s9, %s721_s30  ;;  %p723_p3 = pneg %p987_p13 }
  0x38   : > { %s726_s29 = scalar_lea.hbm %s1098_s1, 3072  ;;  %p727_p9 = scmp.lt.u32.totalorder %s981_s9, %s1098_s1 }
  0x39   : > { %p724_p5 = pnand %p723_p3, %p722_p0  ;;  %p728_p1 = scmp.lt.u32.totalorder %s726_s29, %s721_s30 }
  0x3a   : > { %p730_p4 = scmp.lt.u32.totalorder %s721_s30, %s981_s9 }
  0x3b   : > { %p725_p7 = pneg %p724_p5  ;;  %p729_p2 = por %p728_p1, %p727_p9 }
  0x3d   : > { %p731_p6 = por %p730_p4, %p729_p2 }
  0x3f   : > { %p732_p8 = pnand %p731_p6, %p725_p7 }
  0x41   : > { %735 = shalt.err (!%p732_p8)
}
  0x42   : > { %s736_s26 = scalar_lea.vmem %s983_s18, 1024  ;;  %s842_s21 = smov [#allocation6]  }
  0x43   : > { %p737_p12 = scmp.ne.s32.totalorder %s983_s18, %s736_s26  ;;  %s741_s4 = sshll.u32 %s842_s21, 4  ;;  %s742_s4 = int_to_ptr.vmem [resolvable:$false] %s741_s4 }
  0x44   : > { %s743_s6 = scalar_lea.vmem %s742_s4, 2048  ;;  %p744_p5 = scmp.lt.s32.totalorder %s983_s18, %s742_s4 }
  0x45   : > { %p739_p10 = pnand %p737_p12, %p723_p3  ;;  %p745_p9 = scmp.lt.s32.totalorder %s743_s6, %s736_s26 }
  0x47   : > { %p740_p0 = pneg %p739_p10  ;;  %p746_p1 = por %p745_p9, %p744_p5 }
  0x49   : > { %p747_p2 = pnand %p746_p1, %p740_p0 }
  0x4b   : > { %750 = shalt.err (!%p747_p2)
}
  0x4c   : > { %620 = dma.hbm_to_vmem [thread:$0]  (!%p987_p13), %s981_s9, 1024, %s983_s18, %s991_s25, %s840_s10, %s840_s10, %s841_s11  }
  0x4d   : > { %p1115_p3 = scmp.ne.s32.totalorder %s1109_s24, 0 }
  0x4e   : > { %p1116_p7 = scmp.ne.s32.totalorder (!%p1115_p3), %s1105_s20, 0 }
  0x4f   : > { %215 = sbr.rel (%p1115_p3) target bundleno = 357 (0x165), region = 32 }
  0x56   : > { %804 = dma.done.wait (%p1116_p7), [#allocation4], 128  }
  0x57   : > { %806 = vsyncadd (%p1116_p7), [#allocation4], 4294967168  ;;  %s1029_s30 = sand.u32 1, %s821_s13   ;;  %p1117_p4 = scmp.ne.s32.totalorder %s1107_s22, 0 }
  0x58   : > { %s548_s19 = sshll.u32 %s1029_s30, 6  ;;  %s222_s29 = scalar_lea.sflag [#allocation7], %s1029_s30 }
  0x59   : > { %s225_s7 = scalar_lea.vmem [#allocation6], %s548_s19 }
  0x5a   : > { %808 = dma.done.wait (%p1117_p4), %s222_s29, 1024  }
  0x5b   : > { %810 = vsyncadd (%p1117_p4), %s222_s29, 4294966272  ;;  %v843_v0 = vmov 0.0   ;;  %vm844_vm0 = vmmov 0   ;;  %v684_v1 = vld [vmem:[%s225_s7] sm:$0xff]   ;;  %v685_v2 = vld [vmem:[%s225_s7 + $0x8] sm:$0xff]   ;;  %p253_p13 = scmp.lt.s32.totalorder %s829_s15, 2 }
  0x5c   : > { %585 = vmatprep.subr.bf16.mxu0 %v843_v0  ;;  %601 = vmatprep.mubr.msk.bf16.mxu0 %vm844_vm0, %v843_v0  ;;  %v686_v3 = vld [vmem:[%s225_s7 + $0x10] sm:$0xff]   ;;  %v687_v4 = vld [vmem:[%s225_s7 + $0x18] sm:$0xff]   ;;  %v688_v5 = vld [vmem:[%s225_s7 + $0x20] sm:$0xff]   ;;  %s549_s22 = sshll.u32 %s1029_s30, 3  ;;  %s570_s25 = sshll.u32 %s829_s15, 7 }
  0x5d   : > { %586 = vmatpush3.bf16.msra.mxu0 %v684_v1  ;;  %v689_v6 = vld [vmem:[%s225_s7 + $0x28] sm:$0xff]   ;;  %v690_v7 = vld [vmem:[%s225_s7 + $0x30] sm:$0xff]   ;;  %v691_v8 = vld [vmem:[%s225_s7 + $0x38] sm:$0xff]   ;;  %s254_s20 = scalar_select %p253_p13, %s829_s15, 2 }
  0x5e   : > { %587 = vmatprep.subr.bf16.mxu0 %v843_v0  ;;  %v692_v9 = vld [vmem:[#allocation3] sm:$0xff]   ;;  %s250_s9 = scalar_lea.vmem [#allocation8], %s549_s22  ;;  %s1049_s21 = scalar_lea.hbm %s1100_s3, %s570_s25 }
  0x5f   : > { %s255_s11 = scalar_lea.vmem %s1099_s2, %s254_s20  ;;  %s423_s18 = sshll.u32 %s250_s9, 4  ;;  %s1044_s18 = int_to_ptr.vmem [resolvable:$true] %s423_s18 }
  0x60   : > { %v559_v11 = vld [vmem:[%s255_s11] ss:$0 sm:$0xff]  ;;  %s408_s4 = scalar_lea.sflag [#allocation5], %s1029_s30  ;;  %s751_s6 = scalar_lea.vmem %s1044_s18, 128 }
  0x61   : > { %588 = vmatpush3.bf16.msra.mxu0 %v685_v2  ;;  %p752_p6 = scmp.ne.s32.totalorder %s1044_s18, %s751_s6  ;;  %s845_s15 = smov [#allocation8]  }
  0x62   : > { %589 = vmatprep.subr.bf16.mxu0 %v843_v0  ;;  %s755_s19 = sshll.u32 %s845_s15, 4  ;;  %s756_s19 = int_to_ptr.vmem [resolvable:$false] %s755_s19 }
  0x63   : > { %p753_p8 = pnand %p752_p6, %p966_p11  ;;  %s757_s29 = scalar_lea.vmem %s756_s19, 256 }
  0x64   : > { %p758_p10 = scmp.lt.s32.totalorder %s1044_s18, %s756_s19  ;;  %p759_p0 = scmp.lt.s32.totalorder %s757_s29, %s751_s6 }
  0x65   : > { %590 = vmatpush3.bf16.msra.mxu0 %v686_v3  ;;  %p754_p12 = pneg %p753_p8 }
  0x66   : > { %591 = vmatprep.subr.bf16.mxu0 %v843_v0  ;;  %p760_p5 = por %p759_p0, %p758_p10 }
  0x68   : > { %p761_p9 = pnand %p760_p5, %p754_p12 }
  0x69   : > { %592 = vmatpush3.bf16.msra.mxu0 %v687_v4 }
  0x6a   : > { %593 = vmatprep.subr.bf16.mxu0 %v843_v0 }
  0x6d   : > { %594 = vmatpush3.bf16.msra.mxu0 %v688_v5 }
  0x6e   : > { %595 = vmatprep.subr.bf16.mxu0 %v843_v0 }
  0x71   : > { %596 = vmatpush3.bf16.msra.mxu0 %v689_v6 }
  0x72   : > { %597 = vmatprep.subr.bf16.mxu0 %v843_v0 }
  0x75   : > { %598 = vmatpush3.bf16.msra.mxu0 %v690_v7 }
  0x76   : > { %599 = vmatprep.subr.bf16.mxu0 %v843_v0 }
  0x79   : > { %600 = vmatpush3.bf16.msra.mxu0 %v691_v8 }
  0x7c   : > { %602 = vmatmul.mubr.bf16.vlgmr.msra.gmra.mrb[0].mxu0 %v692_v9 }
 0x14f   : > { %v372_v10 = vpop.f32.mrb[0].mxu0 }
 0x150   : > { %v603_v12 = vpop.f32.mrb[1].mxu0  ;;  %v395_v14 = vadd.f32 %v559_v11, %v372_v10 }
 0x151   : > { %v375_v13 = vpop.f32.mrb[2].mxu0 }
 0x152   : > { %v396_v15 = vadd.f32 %v559_v11, %v375_v13  ;;  %v604_v16 = vpop.f32.mrb[3].mxu0 }
 0x154   : > { %v574_v17 = vpack.c.bf16 %v396_v15, %v395_v14 }
 0x156   : > { %575 = vst [vmem:[%s250_s9] sm:$0xff] %v574_v17  }
 0x157   : > { %764 = shalt.err (!%p761_p9)
}
 0x158   : > { %s765_s7 = scalar_lea.hbm %s1049_s21, 128  ;;  %s769_s24 = scalar_lea.hbm %s1100_s3, 384 }
 0x159   : > { %p766_p1 = scmp.ne.s32.totalorder %s1049_s21, %s765_s7  ;;  %p770_p7 = scmp.lt.u32.totalorder %s1049_s21, %s1100_s3 }
 0x15a   : > { %p771_p4 = scmp.lt.u32.totalorder %s769_s24, %s765_s7  ;;  %p773_p6 = scmp.lt.u32.totalorder %s765_s7, %s1049_s21 }
 0x15b   : > { %p767_p2 = pnand %p766_p1, %p966_p11 }
 0x15c   : > { %p772_p13 = por %p771_p4, %p770_p7 }
 0x15d   : > { %p768_p3 = pneg %p767_p2 }
 0x15e   : > { %p774_p8 = por %p773_p6, %p772_p13 }
 0x160   : > { %p775_p12 = pnand %p774_p8, %p768_p3 }
 0x162   : > { %778 = shalt.err (!%p775_p12)
}
 0x163   : > { %s846_s9 = smov 64   ;;  %s847_s25 = smov 4  }
 0x164   : > { %611 = dma.vmem_to_hbm [thread:$0]  (%p966_p11), %s1044_s18, 128, %s1049_s21, %s408_s4, %s846_s9, %s846_s9, %s847_s25  }
 0x165 PF: > { %p628_p10 = scmp.ge.s32.totalorder %s837_s17, 2  ;;  %s438_s8 = sand.u32 1, %s817_s12  }
 0x166   : > { %p1118_p0 = scmp.ne.s32.totalorder %s1108_s23, 0  ;;  %s439_s26 = scalar_lea.sflag [#allocation5], %s438_s8 }
 0x168   : > { %p622_p5 = pnand %p628_p10, %p1118_p0 }
 0x16a   : > { %812 = dma.done.wait (!%p622_p5), %s439_s26, 128  }
 0x16b   : > { %814 = vsyncadd (!%p622_p5), %s439_s26, 4294967168  ;;  %s20_s17 = sadd.s32 1, %s837_s17   ;;  %s1119_s12 = smov %s821_s13 }
 0x16c   : > { %p17_p9 = scmp.ge.s32.totalorder %s20_s17, 5   ;;  %s1120_s13 = smov %s825_s14 }
 0x16d   : > { %s1121_s14 = smov %s975_s5  ;;  %s1122_s15 = smov %s833_s16 }
 0x16e   : > { %s1123_s16 = smov %s1125_s28  ;;  %19 = sbr.rel (!%p17_p9) target bundleno = 7 (0x7), region = 94 }
 0x175   :  { %444 = vsyncpa [#allocation4], 1 }
 0x176   :  { %446 = vsyncpa [#allocation4 + $0x1], 1 }
 0x177   :  { %447 = vsyncpa [#allocation7], 1 }
 0x178   :  { %449 = vsyncpa [#allocation7 + $0x1], 1 }
 0x179   :  { %450 = vsyncpa [#allocation5], 1 }
 0x17a   :  { %452 = vsyncpa [#allocation5 + $0x1], 1 }

</bundles_post_ra>
